<compile_context>
chip_gen: v7x
topology: tpu7x:2x2x1
jax: 0.10.0
libtpu: 0.0.40
codegen_flags: <defaults>
</compile_context>

<pallas_src>
import dataclasses
from typing import List

import jax
import jax.numpy as jnp
from jax.experimental import pallas as pl
from jax.experimental.pallas import tpu as pltpu


# ----------------------------------------------------------------------------
# Layout constants.
# ----------------------------------------------------------------------------
IN_FEATURES = 34
H1, H2, OUT_FEATURES = 150, 25, 2

K1_PAD = 48       # augmented (features + bias-one) width, bf16-tile aligned
H1_PAD = 256      # padded hidden-1 width (>=150), lane multiple
H2_PAD = 128      # padded hidden-2 width (>=25), lane multiple
OUT_PAD = 128     # lane-dense kernel output width (real logits in cols 0:2)
LANES = 256       # slab lane width

R1 = 0            # layer-1 region rows [0, 48)
R2 = K1_PAD       # layer-2 region rows [48, 304); layer-3 packed in its
                  # first 128 rows, lanes [128, 256)
SLAB_ROWS = K1_PAD + H1_PAD      # 304  (was 432)

TM_MAX = 256      # batch tile: full-M pass on the 256-wide v6e/v7x MXU
MIN_BATCH_PAD = 16


# ----------------------------------------------------------------------------
# Python-side feature construction (faithful to the PyTorch forward's glue).
# Host-side scalar/string code, no tensor math — stays in Python by design.
# ----------------------------------------------------------------------------
def always_increase(price_list):
    # Faithful (bug-for-bug) reproduction: `increase & x > 0` parses as
    # `(increase & x) > 0` == `(1 & 4) > 0` == False, so the loop never runs
    # and this always returns 0, exactly like the PyTorch module.
    ret = 0
    increase = True
    x = 4
    while increase & x > 0:
        if price_list[x] >= price_list[x - 1]:
            ret += 0.25
        else:
            increase = False
    return ret


def zero_div(c, d):
    if c == 0:
        return 0
    if d == 0:
        return 1
    return c / d


@dataclasses.dataclass
class InputMinute:
    product: str
    minute_list: List[float]
    operation_list: List[float]
    average_5: float
    average_10: float
    average_15: float
    average: float


_PRODUCTS = [
    "ethereum", "cardano", "dogecoin", "polkadot", "ripple",
    "bitcoin", "binance coin", "uniswap", "iota", "luna coin",
]


def build_features(m: InputMinute):
    """Replicates Beth.forward's python feature construction -> 34 floats."""
    i = [0] * 10
    if m.product in _PRODUCTS:
        i[_PRODUCTS.index(m.product)] = 1

    i.append(1 if m.minute_list[4] > m.minute_list[3] else 0)
    i.append(1 if m.minute_list[3] > m.minute_list[2] else 0)
    i.append(1 if m.minute_list[2] > m.minute_list[1] else 0)
    i.append(1 if m.minute_list[1] > m.minute_list[0] else 0)

    amount_price = 0.0
    for e in m.minute_list:
        amount_price += e
    for e in m.minute_list:
        i.append(e / amount_price)

    i.append(always_increase(m.minute_list))

    amount_op = 0.0
    for e in range(4):
        amount_op += m.operation_list[e]
    for e in range(4):
        i.append(zero_div(m.operation_list[e], amount_op))

    i.append(1 if m.operation_list[4] > m.operation_list[3] else 0)
    i.append(1 if m.operation_list[3] > m.operation_list[2] else 0)
    i.append(1 if m.operation_list[2] > m.operation_list[1] else 0)
    i.append(1 if m.operation_list[1] > m.operation_list[0] else 0)

    i.append(1 if m.minute_list[4] > m.average_5 else 0)
    i.append(1 if m.average_5 > m.average_10 else 0)
    i.append(1 if m.average_10 > m.average_15 else 0)
    i.append(1 if m.average_15 > m.average else 0)

    i.append(always_increase(m.operation_list))
    i.append(1 if m.minute_list[4] > m.minute_list[0] else 0)

    assert len(i) == IN_FEATURES
    return [float(v) for v in i]


# ----------------------------------------------------------------------------
# Parameter packing: ONE zero-padded bf16 slab [304, 256], biases folded in.
#
#   Layer 1 (rows 0:48):    slab[0:34,  0:150] = w1
#                           slab[34,    0:150] = b1
#                           slab[34,      255] = 1    (layer-2 bias carrier)
#   Layer 2 (rows 48:304,
#            lanes 0:128):  slab[48:198, 0:25] = w2
#                           slab[303,    0:25] = b2
#                           slab[303,     127] = 1    (layer-3 bias carrier)
#   Layer 3 (rows 48:176,
#            lanes 128:256):slab[48:73, 128:130] = w3
#                           slab[175,   128:130] = b3
#
# With the kernel-built constant-1 input column (col 34), a 1.0 flows through
# h1[:,255] and h2[:,127], so every layer's bias is applied inside its matmul.
# ----------------------------------------------------------------------------
def pack_params(params):
    w1, b1, w2, b2, w3, b3 = params
    slab = jnp.zeros((SLAB_ROWS, LANES), jnp.float32)
    # Layer 1 region.
    slab = slab.at[R1:R1 + IN_FEATURES, 0:H1].set(w1)
    slab = slab.at[R1 + IN_FEATURES, 0:H1].set(b1)
    slab = slab.at[R1 + IN_FEATURES, H1_PAD - 1].set(1.0)
    # Layer 2 region (lanes 0:128).
    slab = slab.at[R2:R2 + H1, 0:H2].set(w2)
    slab = slab.at[R2 + H1_PAD - 1, 0:H2].set(b2)
    slab = slab.at[R2 + H1_PAD - 1, H2_PAD - 1].set(1.0)
    # Layer 3 packed into lanes 128:256 of the first 128 layer-2 rows.
    slab = slab.at[R2:R2 + H2, H2_PAD:H2_PAD + OUT_FEATURES].set(w3)
    slab = slab.at[R2 + H2_PAD - 1, H2_PAD:H2_PAD + OUT_FEATURES].set(b3)
    return slab.astype(jnp.bfloat16)


# ----------------------------------------------------------------------------
# Pallas kernel: build augmented input in VMEM, then 3 chained matmuls +
# ReLUs.  bf16 MXU operands, f32 accumulate, lane-dense bf16 output tile.
# ----------------------------------------------------------------------------
def beth_mlp_kernel(x_ref, p_ref, o_ref, xa_ref):
    tm = xa_ref.shape[0]
    # Augmented operand [TM, 48]: [ x | 1 | 0...0 ] built in f32 scratch
    # (robust full-store + aligned partial store), cast to bf16 on read.
    lane = jax.lax.broadcasted_iota(jnp.int32, (tm, K1_PAD), 1)
    xa_ref[...] = jnp.where(lane == IN_FEATURES, 1.0, 0.0)
    xa_ref[:, 0:IN_FEATURES] = x_ref[...]
    xa = xa_ref[...].astype(jnp.bfloat16)                      # [TM, 48]

    w1 = p_ref[R1:R1 + K1_PAD, :]                              # [48, 256]
    h1 = jnp.dot(xa, w1, preferred_element_type=jnp.float32)
    h1 = jnp.maximum(h1, 0.0).astype(jnp.bfloat16)             # [TM, 256]

    w2 = p_ref[R2:R2 + H1_PAD, 0:H2_PAD]                       # [256, 128]
    h2 = jnp.dot(h1, w2, preferred_element_type=jnp.float32)
    h2 = jnp.maximum(h2, 0.0).astype(jnp.bfloat16)             # [TM, 128]

    w3 = p_ref[R2:R2 + H2_PAD, H2_PAD:2 * H2_PAD]              # [128, 128]
    out = jnp.dot(h2, w3, preferred_element_type=jnp.float32)
    o_ref[...] = out.astype(o_ref.dtype)                       # [TM, 128] bf16


@jax.jit
def _beth_forward_jit(x_padded, slab):
    """x_padded: [n_pad, 34] f32 (bucketed), slab: [304, 256] bf16
       -> logits [n_pad, 2] f32."""
    n_pad = x_padded.shape[0]
    tm = min(TM_MAX, n_pad)
    grid = (n_pad // tm,)

    cost = pl.CostEstimate(
        flops=2 * n_pad * (K1_PAD * H1_PAD + H1_PAD * H2_PAD + H2_PAD * H2_PAD),
        transcendentals=0,
        bytes_accessed=(n_pad * IN_FEATURES * 4      # x (f32)
                        + SLAB_ROWS * LANES * 2      # param slab (bf16)
                        + n_pad * OUT_PAD * 2),      # padded output (bf16)
    )

    out_pad = pl.pallas_call(
        beth_mlp_kernel,
        out_shape=jax.ShapeDtypeStruct((n_pad, OUT_PAD), jnp.bfloat16),
        grid=grid,
        in_specs=[
            pl.BlockSpec((tm, IN_FEATURES), lambda i: (i, 0)),     # batch tile
            pl.BlockSpec((SLAB_ROWS, LANES), lambda i: (0, 0)),    # resident slab
        ],
        out_specs=pl.BlockSpec((tm, OUT_PAD), lambda i: (i, 0)),
        scratch_shapes=[pltpu.VMEM((tm, K1_PAD), jnp.float32)],
        compiler_params=pltpu.CompilerParams(
            dimension_semantics=("parallel",)),                    # 2x on v7x
        cost_estimate=cost,
    )(x_padded, slab)

    # Tiny epilogue: lane slice + f32 cast (row un-padding handled by caller).
    return out_pad[:, :OUT_FEATURES].astype(jnp.float32)


def _bucket_batch(n):
    """Bucket batch sizes so only a handful of compiled shapes exist."""
    if n <= MIN_BATCH_PAD:
        return MIN_BATCH_PAD
    if n <= TM_MAX:
        return 1 << (n - 1).bit_length()
    return -(-n // TM_MAX) * TM_MAX


def beth_forward(features, slab):
    """Batched MLP forward: features [B, 34] -> logits [B, 2] (f32)."""
    features = jnp.asarray(features, jnp.float32)
    n = features.shape[0]
    n_pad = _bucket_batch(n)
    if n_pad != n:
        # Bucketed zero-pad lives outside the jit on purpose: avoids a Mosaic
        # recompile per distinct B (recompiles dwarf any kernel-level win).
        features = jnp.pad(features, ((0, n_pad - n), (0, 0)))
    out = _beth_forward_jit(features, slab)       # [n_pad, 2]
    return out[:n] if n_pad != n else out


def beth_module_forward(input_minute, slab):
    """Full module semantics: build features once, return [2, 2] like torch."""
    feats = jnp.asarray(build_features(input_minute), jnp.float32)[None, :]
    out1 = beth_forward(feats, slab)              # [1, 2]
    # The PyTorch module stacks the identical row twice; broadcast instead of
    # carrying a duplicated row through the kernel.
    return jnp.broadcast_to(out1, (2, OUT_FEATURES))


# ----------------------------------------------------------------------------
# Pure-JAX f32 reference (for tolerance checking the bf16 kernel).
# ----------------------------------------------------------------------------
def beth_reference(features, params):
    w1, b1, w2, b2, w3, b3 = params
    h1 = jnp.maximum(features @ w1 + b1, 0.0)
    h2 = jnp.maximum(h1 @ w2 + b2, 0.0)
    return h2 @ w3 + b3


# ----------------------------------------------------------------------------
# Deterministic parameter init (mimics nn.Linear default: U(-1/sqrt(in), ...)).
# ----------------------------------------------------------------------------
def init_params(key):
    def linear(k, fan_in, fan_out):
        kw, kb = jax.random.split(k)
        bound = float(fan_in) ** -0.5
        w = jax.random.uniform(kw, (fan_in, fan_out), jnp.float32, -bound, bound)
        b = jax.random.uniform(kb, (fan_out,), jnp.float32, -bound, bound)
        return w, b

    k1, k2, k3 = jax.random.split(key, 3)
    w1, b1 = linear(k1, IN_FEATURES, H1)
    w2, b2 = linear(k2, H1, H2)
    w3, b3 = linear(k3, H2, OUT_FEATURES)
    return (w1, b1, w2, b2, w3, b3)


# TODO(synk): Beth.learn (CrossEntropyLoss + Adam training step) is host-side
# training logic with no Pallas forward-pass equivalent; not implemented.

if __name__ == "__main__":
    key = jax.random.PRNGKey(0)
    k_params, k_minute, k_op, k_batch, k_big = jax.random.split(key, 5)

    params = init_params(k_params)
    slab = pack_params(params)                # one-time packing

    minute_vals = [float(v) for v in
                   jax.random.uniform(k_minute, (5,), jnp.float32, 1.0, 10.0)]
    op_vals = [float(v) for v in
               jax.random.uniform(k_op, (5,), jnp.float32, 0.0, 5.0)]

    input_minute = InputMinute(
        product="ethereum",
        minute_list=minute_vals,
        operation_list=op_vals,
        average_5=sum(minute_vals) / 5.0,
        average_10=sum(minute_vals) / 5.0 * 0.98,
        average_15=sum(minute_vals) / 5.0 * 0.95,
        average=sum(minute_vals) / 5.0 * 0.9,
    )

    # Module-faithful single-minute forward: [2, 2] output.
    out = jax.block_until_ready(beth_module_forward(input_minute, slab))
    assert out.shape == (2, OUT_FEATURES) and out.dtype == jnp.float32

    # Tolerance check against the f32 reference (bf16 rounding only).
    feats = jnp.asarray(build_features(input_minute), jnp.float32)[None, :]
    ref = jnp.broadcast_to(beth_reference(feats, params), (2, OUT_FEATURES))
    assert float(jnp.max(jnp.abs(out - ref))) < 1e-1

    # Batched path, single tile (grid = 1).
    xb = jax.random.uniform(k_batch, (16, IN_FEATURES), jnp.float32)
    outb = jax.block_until_ready(beth_forward(xb, slab))
    refb = beth_reference(xb, params)
    assert outb.shape == (16, OUT_FEATURES)
    assert float(jnp.max(jnp.abs(outb - refb))) < 1e-1

    # Batched path, multi-tile grid (B=300 -> bucketed to 512, grid = 2,
    # exercises the parallel batch grid + resident slab).
    xg = jax.random.uniform(k_big, (300, IN_FEATURES), jnp.float32)
    outg = jax.block_until_ready(beth_forward(xg, slab))
    refg = beth_reference(xg, params)
    assert outg.shape == (300, OUT_FEATURES)
    assert float(jnp.max(jnp.abs(outg - refg))) < 1e-1

    print("KERNEL_OK")
</pallas_src>

<mosaic_0001>
module attributes {stable_mosaic.version = 11 : i64} {
  func.func @beth_mlp_kernel(%arg0: i32, %arg1: memref<16x34xf32, #tpu.memory_space<vmem>>, %arg2: memref<304x256xbf16, #tpu.memory_space<vmem>>, %arg3: memref<16x128xbf16, #tpu.memory_space<vmem>>, %arg4: memref<16x48xf32, #tpu.memory_space<vmem>>) attributes {dimension_semantics = [#tpu.dimension_semantics<parallel>], iteration_bounds = array<i64: 1>, scalar_prefetch = 0 : i64, scratch_operands = 1 : i64, tpu.core_type = #tpu.core_type<tc>, window_params = [{transform_indices = @transform_0, window_bounds = array<i64: 16, 34>}, {pipeline_mode = #tpu.pipeline_mode<synchronous>, transform_indices = @transform_1, window_bounds = array<i64: 304, 256>}, {transform_indices = @transform_2, window_bounds = array<i64: 16, 128>}]} {
    %0 = tpu.iota {dimensions = array<i32: 1>} : vector<16x48xi32>
    %c34_i32 = arith.constant 34 : i32
    %1 = vector.broadcast %c34_i32 : i32 to vector<16x48xi32>
    %2 = arith.cmpi eq, %0, %1 : vector<16x48xi32>
    %cst = arith.constant 1.000000e+00 : f32
    %cst_0 = arith.constant 0.000000e+00 : f32
    %3 = vector.broadcast %cst : f32 to vector<16x48xf32>
    %4 = vector.broadcast %cst_0 : f32 to vector<16x48xf32>
    %5 = arith.select %2, %3, %4 : vector<16x48xi1>, vector<16x48xf32>
    %c0 = arith.constant 0 : index
    %c0_1 = arith.constant 0 : index
    %6 = vector.load %arg4[%c0, %c0_1] : memref<16x48xf32, #tpu.memory_space<vmem>>, vector<16x48xf32>
    tpu.vector_store %arg4[%c0, %c0_1], %5 {strides = array<i32>} : memref<16x48xf32, #tpu.memory_space<vmem>>, vector<16x48xf32>,
    %c0_2 = arith.constant 0 : index
    %c0_3 = arith.constant 0 : index
    %7 = vector.load %arg1[%c0_2, %c0_3] : memref<16x34xf32, #tpu.memory_space<vmem>>, vector<16x34xf32>
    %c0_4 = arith.constant 0 : index
    %c0_5 = arith.constant 0 : index
    %8 = vector.load %arg4[%c0_4, %c0_5] : memref<16x48xf32, #tpu.memory_space<vmem>>, vector<16x34xf32>
    tpu.vector_store %arg4[%c0_4, %c0_5], %7 {strides = array<i32>} : memref<16x48xf32, #tpu.memory_space<vmem>>, vector<16x34xf32>,
    %c0_6 = arith.constant 0 : index
    %c0_7 = arith.constant 0 : index
    %9 = vector.load %arg4[%c0_6, %c0_7] : memref<16x48xf32, #tpu.memory_space<vmem>>, vector<16x48xf32>
    %10 = arith.truncf %9 : vector<16x48xf32> to vector<16x48xbf16>
    %c0_8 = arith.constant 0 : index
    %c0_9 = arith.constant 0 : index
    %11 = vector.load %arg2[%c0_8, %c0_9] : memref<304x256xbf16, #tpu.memory_space<vmem>>, vector<48x256xbf16>
    %cst_10 = arith.constant dense<0.000000e+00> : vector<16x256xf32>
    %12 = tpu.matmul %10, %11, %cst_10 {dimension_numbers = #tpu.dot_dimension_numbers<[1], [0], [0], [1], [0, 0, 1, 1], [], []>} : vector<16x48xbf16>, vector<48x256xbf16>, vector<16x256xf32> -> vector<16x256xf32>
    %cst_11 = arith.constant 0.000000e+00 : f32
    %13 = vector.broadcast %cst_11 : f32 to vector<16x256xf32>
    %14 = arith.maximumf %12, %13 : vector<16x256xf32>
    %15 = arith.truncf %14 : vector<16x256xf32> to vector<16x256xbf16>
    %c48 = arith.constant 48 : index
    %c0_12 = arith.constant 0 : index
    %16 = vector.load %arg2[%c48, %c0_12] : memref<304x256xbf16, #tpu.memory_space<vmem>>, vector<256x128xbf16>
    %cst_13 = arith.constant dense<0.000000e+00> : vector<16x128xf32>
    %17 = tpu.matmul %15, %16, %cst_13 {dimension_numbers = #tpu.dot_dimension_numbers<[1], [0], [0], [1], [0, 0, 1, 1], [], []>} : vector<16x256xbf16>, vector<256x128xbf16>, vector<16x128xf32> -> vector<16x128xf32>
    %cst_14 = arith.constant 0.000000e+00 : f32
    %18 = vector.broadcast %cst_14 : f32 to vector<16x128xf32>
    %19 = arith.maximumf %17, %18 : vector<16x128xf32>
    %20 = arith.truncf %19 : vector<16x128xf32> to vector<16x128xbf16>
    %c48_15 = arith.constant 48 : index
    %c128 = arith.constant 128 : index
    %21 = vector.load %arg2[%c48_15, %c128] : memref<304x256xbf16, #tpu.memory_space<vmem>>, vector<128x128xbf16>
    %cst_16 = arith.constant dense<0.000000e+00> : vector<16x128xf32>
    %22 = tpu.matmul %20, %21, %cst_16 {dimension_numbers = #tpu.dot_dimension_numbers<[1], [0], [0], [1], [0, 0, 1, 1], [], []>} : vector<16x128xbf16>, vector<128x128xbf16>, vector<16x128xf32> -> vector<16x128xf32>
    %23 = arith.truncf %22 : vector<16x128xf32> to vector<16x128xbf16>
    %c0_17 = arith.constant 0 : index
    %c0_18 = arith.constant 0 : index
    %24 = vector.load %arg3[%c0_17, %c0_18] : memref<16x128xbf16, #tpu.memory_space<vmem>>, vector<16x128xbf16>
    tpu.vector_store %arg3[%c0_17, %c0_18], %23 {strides = array<i32>} : memref<16x128xbf16, #tpu.memory_space<vmem>>, vector<16x128xbf16>,
    return
  }
  func.func @transform_0(%arg0: i32) -> (i32, i32) {
    %c0_i32 = arith.constant 0 : i32
    %c0_i32_0 = arith.constant 0 : i32
    return %arg0, %c0_i32 : i32, i32
  }
  func.func @transform_1(%arg0: i32) -> (i32, i32) {
    %c0_i32 = arith.constant 0 : i32
    %c0_i32_0 = arith.constant 0 : i32
    %c0_i32_1 = arith.constant 0 : i32
    return %c0_i32, %c0_i32_0 : i32, i32
  }
  func.func @transform_2(%arg0: i32) -> (i32, i32) {
    %c0_i32 = arith.constant 0 : i32
    %c0_i32_0 = arith.constant 0 : i32
    return %arg0, %c0_i32 : i32, i32
  }
}

</mosaic_0001>

<bundles_post_ra>
// kernel: _beth_forward_jit.1
= control target key start
LH: loop header
LB: loop body
LE: loop exit
PB: predicated region body
PF: predicated region fallthrough
CT: control target
= control target key end

     0   :  { %7 = vsyncpa [#allocation4], 0  ;;  %s677_s0 = inlined_call_operand.hbm [shape: f32[16,34], index: 0, kind: input, shape index: {}]   ;;  %s678_s1 = inlined_call_operand.hbm [shape: bf16[304,256], index: 1, kind: input, shape index: {}]   ;;  %s679_s2 = inlined_call_operand.vmem [shape: bf16[16,128], index: 2, kind: output, shape index: {}]  }
   0x1   :  { %8 = vsyncpa [#allocation6], 0  ;;  %s615_s9 = smov [#allocation3]   ;;  %s567_s13 = scalar_lea.hbm %s677_s0, 256 }
   0x2   :  { %s14_s10 = sshll.u32 %s615_s9, 4  ;;  %p568_p0 = scmp.ne.s32.totalorder %s677_s0, %s567_s13  ;;  %s15_s10 = int_to_ptr.vmem [resolvable:$true] %s14_s10 }
   0x3   :  { %p571_p1 = scmp.lt.u32.totalorder %s567_s13, %s677_s0 }
   0x5   :  { %p573_p2 = pnand %p571_p1, %p568_p0 }
   0x7   :  { %576 = shalt.err (!%p573_p2)
}
   0x8   :  { %s577_s18 = scalar_lea.vmem %s15_s10, 256  ;;  %p582_p4 = scmp.lt.s32.totalorder %s15_s10, %s15_s10 }
   0x9   :  { %p578_p3 = scmp.ne.s32.totalorder %s15_s10, %s577_s18  ;;  %p583_p5 = scmp.lt.s32.totalorder %s577_s18, %s577_s18 }
   0xb   :  { %p584_p6 = por %p583_p5, %p582_p4 }
   0xd   :  { %p585_p7 = pnand %p584_p6, %p578_p3 }
   0xf   :  { %588 = shalt.err (!%p585_p7)
}
  0x10   :  { %s616_s19 = smov 128   ;;  %s617_s20 = smov 8  }
  0x11   :  { %20 = dma.hbm_to_vmem [thread:$0]  %s677_s0, 256, %s15_s10, [#allocation4], %s616_s19, %s616_s19, %s617_s20  }
  0x12   :  { %s618_s23 = smov [#allocation5]   ;;  %s589_s27 = scalar_lea.hbm %s678_s1, 4864 }
  0x13   :  { %s26_s24 = sshll.u32 %s618_s23, 4  ;;  %p590_p8 = scmp.ne.s32.totalorder %s678_s1, %s589_s27  ;;  %s27_s24 = int_to_ptr.vmem [resolvable:$true] %s26_s24 }
  0x14   :  { %p593_p9 = scmp.lt.u32.totalorder %s589_s27, %s678_s1 }
  0x16   :  { %p595_p10 = pnand %p593_p9, %p590_p8 }
  0x18   :  { %598 = shalt.err (!%p595_p10)
}
  0x19   :  { %s599_s4 = scalar_lea.vmem %s27_s24, 4864  ;;  %p604_p12 = scmp.lt.s32.totalorder %s27_s24, %s27_s24 }
  0x1a   :  { %p600_p11 = scmp.ne.s32.totalorder %s27_s24, %s599_s4  ;;  %p605_p13 = scmp.lt.s32.totalorder %s599_s4, %s599_s4 }
  0x1c   :  { %p606_p0 = por %p605_p13, %p604_p12 }
  0x1e   :  { %p607_p1 = pnand %p606_p0, %p600_p11 }
  0x20   :  { %610 = shalt.err (!%p607_p1)
}
  0x21   :  { %32 = dma.hbm_to_vmem [thread:$0]  %s678_s1, 4864, %s27_s24, [#allocation6], %s616_s19, %s616_s19, %s617_s20  }
  0x22   :  { %611 = dma.done.wait [#allocation4], 256  }
  0x23   :  { %612 = vsyncadd [#allocation4], 4294967040 }
  0x24   :  { %613 = dma.done.wait [#allocation6], 4864  }
  0x25   :  { %614 = vsyncadd [#allocation6], 4294962432  ;;  %v40_v0 = vlaneseq  ;;  %v619_v1 = vmov 0   ;;  %vm44_vm0 = vcmask 392192   ;;  %v620_v3 = vmov 0.0   ;;  %v47_v10 = vld [vmem:[#allocation3] sm:$0xff] }
  0x26   :  { %126 = vmatprep.mubr.bf16.mxu0 %v619_v1  ;;  %v534_v5 = vld [vmem:[#allocation5 + $0x4] ss:$8 sps:$4 sm:$0xff]   ;;  %v536_v6 = vld [vmem:[#allocation5] ss:$8 sps:$4 sm:$0xff]   ;;  %v537_v7 = vld [vmem:[#allocation5 + $0x14] ss:$8 sps:$4 sm:$0xff]  }
  0x27   :  { %v41_v2 = vand.u32 127, %v40_v0  ;;  %94 = vmatprep.subr.bf16.mxu0 %v534_v5  ;;  %vm49_vm2 = vcmask 277504   ;;  %v539_v8 = vld [vmem:[#allocation5 + $0x10] ss:$8 sps:$4 sm:$0xff]   ;;  %v540_v9 = vld [vmem:[#allocation5 + $0x24] ss:$8 sps:$4 sm:$0xff]  }
  0x28   :  { %95 = vmatpush1.bf16.msra.mxu0 %v536_v6  ;;  %v48_v11 = vld [vmem:[#allocation3 + $0x8] sm:$0xff]  ;;  %v542_v12 = vld [vmem:[#allocation5 + $0x20] ss:$8 sps:$4 sm:$0xff]   ;;  %v560_v33 = vld [vmem:[#allocation5 + $0x44] ss:$8 sps:$4 sm:$0xff]   ;;  %vm621_vm3 = vmmov 0  }
  0x29   :  { %vm42_vm1 = vcmp.eq.s32.totalorder %v41_v2, 34  ;;  %96 = vmatprep.subr.bf16.mxu0 %v537_v7  ;;  %v543_v13 = vld [vmem:[#allocation5 + $0xb0] ss:$8 sps:$4 sm:$0xff]   ;;  %v545_v15 = vld [vmem:[#allocation5 + $0xc0] ss:$8 sps:$4 sm:$0xff]  }
  0x2a   :  { %v43_v4 = vsel %vm42_vm1, 1.0, %v620_v3  ;;  %v544_v14 = vld [vmem:[#allocation5 + $0x30] ss:$8 sps:$4 sm:$0xff]   ;;  %476 = vmatprep.subr.bf16.mxu1 %v543_v13  ;;  %v546_v16 = vld [vmem:[#allocation5 + $0x40] ss:$8 sps:$4 sm:$0xff]  }
  0x2b   :  { %45 = vst.msk [vmem:[#allocation2] sm:$0xff] %vm44_vm0, %v43_v4  ;;  %46 = vst.msk [vmem:[#allocation2 + $0x8] sm:$0xff] %vm44_vm0, %v43_v4  ;;  %477 = vmatpush3.bf16.msra.mxu1 %v544_v14  ;;  %v547_v17 = vld [vmem:[#allocation5 + $0xd0] ss:$8 sps:$4 sm:$0xff]   ;;  %v549_v22 = vld [vmem:[#allocation5 + $0xe0] ss:$8 sps:$4 sm:$0xff]  }
  0x2c   :  { %50 = vst.msk [vmem:[#allocation2] sm:$0xff] %vm49_vm2, %v47_v10  ;;  %51 = vst.msk [vmem:[#allocation2 + $0x8] sm:$0xff] %vm49_vm2, %v48_v11  ;;  %97 = vmatpush1.bf16.msra.mxu0 %v539_v8  ;;  %478 = vmatprep.subr.bf16.mxu1 %v545_v15  ;;  %v548_v18 = vld [vmem:[#allocation5 + $0x50] ss:$8 sps:$4 sm:$0xff]   ;;  %v550_v23 = vld [vmem:[#allocation5 + $0x60] ss:$8 sps:$4 sm:$0xff]  }
  0x2d   :  { %98 = vmatprep.subr.bf16.mxu0 %v540_v9  ;;  %v551_v24 = vld [vmem:[#allocation5 + $0xf0] ss:$8 sps:$4 sm:$0xff]   ;;  %v553_v26 = vld [vmem:[#allocation5 + $0x100] ss:$8 sps:$4 sm:$0xff]   ;;  %v559_v32 = vld [vmem:[#allocation5 + $0x34] ss:$8 sps:$4 sm:$0xff]  }
  0x2e   :  { %v552_v25 = vld [vmem:[#allocation5 + $0x70] ss:$8 sps:$4 sm:$0xff]   ;;  %v554_v27 = vld [vmem:[#allocation5 + $0x80] ss:$8 sps:$4 sm:$0xff]   ;;  %v561_v34 = vld [vmem:[#allocation5 + $0x54] ss:$8 sps:$4 sm:$0xff]  }
  0x2f   :  { %479 = vmatpush3.bf16.msra.mxu1 %v546_v16  ;;  %v555_v28 = vld [vmem:[#allocation5 + $0x110] ss:$8 sps:$4 sm:$0xff]   ;;  %v557_v30 = vld [vmem:[#allocation5 + $0x120] ss:$8 sps:$4 sm:$0xff]   ;;  %v562_v35 = vld [vmem:[#allocation5 + $0x64] ss:$8 sps:$4 sm:$0xff]  }
  0x30   :  { %99 = vmatpush1.bf16.msra.mxu0 %v542_v12  ;;  %480 = vmatprep.subr.bf16.mxu1 %v547_v17  ;;  %v556_v29 = vld [vmem:[#allocation5 + $0x90] ss:$8 sps:$4 sm:$0xff]   ;;  %v558_v31 = vld [vmem:[#allocation5 + $0xa0] ss:$8 sps:$4 sm:$0xff]   ;;  %v563_v36 = vld [vmem:[#allocation5 + $0x74] ss:$8 sps:$4 sm:$0xff]  }
  0x31   :  { %507 = vmatprep.subr.bf16.mxu0 %v620_v3  ;;  %v564_v37 = vld [vmem:[#allocation5 + $0x84] ss:$8 sps:$4 sm:$0xff]   ;;  %v565_v48 = vld [vmem:[#allocation5 + $0x94] ss:$8 sps:$4 sm:$0xff]  }
  0x32   :  { %v566_v49 = vld [vmem:[#allocation5 + $0xa4] ss:$8 sps:$4 sm:$0xff]  }
  0x33   :  { %v52_v19 = vld [vmem:[#allocation2] sm:$0xff]  ;;  %v53_v20 = vld [vmem:[#allocation2 + $0x8] sm:$0xff]  ;;  %481 = vmatpush3.bf16.msra.mxu1 %v548_v18 }
  0x34   :  { %v54_v21 = vpack.c.bf16 %v53_v20, %v52_v19  ;;  %482 = vmatprep.subr.bf16.mxu1 %v549_v22 }
  0x36   :  { %442 = vmatmul.mubr.msk.bf16.vlgmr.msra.gmra.mrb[0].mxu0 %vm44_vm0, %v54_v21 }
  0x37   :  { %483 = vmatpush3.bf16.msra.mxu1 %v550_v23  ;;  %508 = vmatpush3.bf16.msra.mxu0 %v559_v32 }
  0x38   :  { %484 = vmatprep.subr.bf16.mxu1 %v551_v24  ;;  %509 = vmatprep.subr.bf16.mxu0 %v620_v3 }
  0x39   :  { %523 = vmatprep.mubr.msk.bf16.mxu0 %vm621_vm3, %v620_v3 }
  0x3b   :  { %485 = vmatpush3.bf16.msra.mxu1 %v552_v25  ;;  %510 = vmatpush3.bf16.msra.mxu0 %v560_v33 }
  0x3c   :  { %486 = vmatprep.subr.bf16.mxu1 %v553_v26  ;;  %511 = vmatprep.subr.bf16.mxu0 %v620_v3 }
  0x3f   :  { %487 = vmatpush3.bf16.msra.mxu1 %v554_v27  ;;  %512 = vmatpush3.bf16.msra.mxu0 %v561_v34 }
  0x40   :  { %488 = vmatprep.subr.bf16.mxu1 %v555_v28  ;;  %513 = vmatprep.subr.bf16.mxu0 %v620_v3 }
  0x43   :  { %489 = vmatpush3.bf16.msra.mxu1 %v556_v29  ;;  %514 = vmatpush3.bf16.msra.mxu0 %v562_v35 }
  0x44   :  { %490 = vmatprep.subr.bf16.mxu1 %v557_v30  ;;  %515 = vmatprep.subr.bf16.mxu0 %v620_v3 }
  0x47   :  { %491 = vmatpush3.bf16.msra.mxu1 %v558_v31  ;;  %516 = vmatpush3.bf16.msra.mxu0 %v563_v36 }
  0x48   :  { %517 = vmatprep.subr.bf16.mxu0 %v620_v3 }
  0x4b   :  { %518 = vmatpush3.bf16.msra.mxu0 %v564_v37 }
  0x4c   :  { %519 = vmatprep.subr.bf16.mxu0 %v620_v3 }
  0x4f   :  { %520 = vmatpush3.bf16.msra.mxu0 %v565_v48 }
  0x50   :  { %521 = vmatprep.subr.bf16.mxu0 %v620_v3 }
  0x53   :  { %522 = vmatpush3.bf16.msra.mxu0 %v566_v49 }
 0x109   :  { %v128_v38 = vpop.f32.mrb[0].mxu0 }
 0x10a   :  { %v130_v39 = vpop.f32.mrb[1].mxu0  ;;  %v137_v41 = vmax.f32 %v128_v38, 0.0 }
 0x10b   :  { %v132_v40 = vpop.f32.mrb[2].mxu0  ;;  %v138_v44 = vmax.f32 %v130_v39, 0.0 }
 0x10c   :  { %v139_v42 = vmax.f32 %v132_v40, 0.0  ;;  %v134_v43 = vpop.f32.mrb[3].mxu0 }
 0x10d   :  { %v140_v45 = vmax.f32 %v134_v43, 0.0 }
 0x10e   :  { %v141_v46 = vpack.c.bf16 %v139_v42, %v137_v41 }
 0x10f   :  { %v142_v47 = vpack.c.bf16 %v140_v45, %v138_v44 }
 0x111   :  { %303 = vmatprep.mubr.bf16.mxu1 %v142_v47 }
 0x112   :  { %304 = vmatmul.mubr.bf16.vlgmr.msra.gmra.mrb[0].mxu1 %v141_v46 }
 0x1e5   :  { %v492_v50 = vpop.f32.mrb[0].mxu1 }
 0x1e6   :  { %v493_v51 = vpop.f32.mrb[1].mxu1 }
 0x1e7   :  { %v494_v52 = vadd.f32 %v493_v51, %v492_v50  ;;  %v495_v53 = vpop.f32.mrb[2].mxu1 }
 0x1e8   :  { %v496_v54 = vpop.f32.mrb[3].mxu1 }
 0x1e9   :  { %v497_v55 = vadd.f32 %v496_v54, %v495_v53  ;;  %v312_v56 = vmax.f32 %v494_v52, 0.0 }
 0x1eb   :  { %v313_v57 = vmax.f32 %v497_v55, 0.0 }
 0x1ed   :  { %v314_v58 = vpack.c.bf16 %v313_v57, %v312_v56 }
 0x1ef   :  { %524 = vmatmul.mubr.bf16.vlgmr.msra.gmra.mrb[4].mxu0 %v314_v58 }
 0x2c2   :  { %v413_v59 = vpop.f32.mrb[4].mxu0 }
 0x2c3   :  { %v525_v60 = vpop.f32.mrb[5].mxu0 }
 0x2c4   :  { %v416_v61 = vpop.f32.mrb[6].mxu0 }
 0x2c5   :  { %v474_v62 = vpack.c.bf16 %v416_v61, %v413_v59  ;;  %v526_v63 = vpop.f32.mrb[7].mxu0 }
 0x2c7   :  { %475 = vst [vmem:[%s679_s2] sm:$0xff] %v474_v62  }
 0x2c8   :  { %434 = vsyncpa [#allocation4], 1 }
 0x2c9   :  { %435 = vsyncpa [#allocation6], 1 }

</bundles_post_ra>
